<compile_context>
chip_gen: v7x
topology: tpu7x:2x2x1
jax: 0.10.0
libtpu: 0.0.40
codegen_flags: <defaults>
</compile_context>

<pallas_src>
import math

import numpy as np

import jax
import jax.numpy as jnp
from jax.experimental import pallas as pl
from jax.experimental.pallas import tpu as pltpu


def _make_attn_kernel(B, approx_recip, use_bf16_mxu):
    def _attn_kernel(q_ref, k_ref, v_ref, o_ref):
        d = q_ref.shape[-1]
        scale = 1.0 / math.sqrt(d)

        # B is tiny and static -> unrolled loop, each iteration is clean 2-D
        # MXU work on (S, D)/(S, S) tiles (no batched dot_general).
        for b in range(B):
            qb = q_ref[b].astype(jnp.float32) * scale       # (S, D), scale folded
            kb = k_ref[b].astype(jnp.float32)               # (S, D)
            vb = v_ref[b].astype(jnp.float32)               # (S, D)

            if use_bf16_mxu:
                qb_m = qb.astype(jnp.bfloat16)
                kb_m = kb.astype(jnp.bfloat16)
            else:
                qb_m, kb_m = qb, kb

            # scores = q @ k^T : contract last dims directly (no transpose).
            scores = jax.lax.dot_general(
                qb_m, kb_m,
                dimension_numbers=(((1,), (1,)), ((), ())),
                preferred_element_type=jnp.float32)          # (S, S)

            # Un-normalized softmax; normalization is deferred past the PV matmul.
            row_max = jnp.max(scores, axis=-1, keepdims=True)
            p = jnp.exp(scores - row_max)                    # (S, S)
            denom = jnp.sum(p, axis=-1, keepdims=True)       # (S, 1)

            if use_bf16_mxu:
                p_m = p.astype(jnp.bfloat16)
                v_m = vb.astype(jnp.bfloat16)
            else:
                p_m, v_m = p, vb

            out_un = jnp.dot(p_m, v_m,
                             preferred_element_type=jnp.float32)   # (S, D)

            # Deferred normalization: S*D multiplies instead of S*S.
            out = out_un * pl.reciprocal(denom, approx=approx_recip)
            o_ref[b] = out.astype(o_ref.dtype)

    return _attn_kernel


def sdpa_pallas(q, k, v, mask=None, *, approx_recip=True, use_bf16_mxu=False):
    """Forward pass of the PyTorch Model's attention.

    `mask` is accepted for signature parity but, being constant (+1.0
    everywhere in the original module), it is softmax-invariant and not passed
    to the kernel.  Concrete masks are checked for constancy before being
    discarded.
    """
    if mask is not None:
        try:
            m = np.asarray(mask, dtype=np.float32)
            constant = bool(np.all(m == m.reshape(-1)[0]))
        except Exception:
            # Abstract tracer: cannot inspect; documented assumption applies.
            constant = True
        if not constant:
            raise ValueError(
                "sdpa_pallas assumes a constant additive mask (softmax-"
                "invariant); a non-constant mask requires restoring the "
                "in-kernel mask add.")

    B, S, D = q.shape

    cost = pl.CostEstimate(
        flops=4 * B * S * S * D,           # QK^T + PV
        transcendentals=B * S * S,         # exp
        bytes_accessed=4 * 4 * B * S * D,  # 3 inputs + 1 output, f32
    )

    vmem_spec = pl.BlockSpec(memory_space=pltpu.MemorySpace.VMEM)

    return pl.pallas_call(
        _make_attn_kernel(B, approx_recip, use_bf16_mxu),
        out_shape=jax.ShapeDtypeStruct((B, S, D), q.dtype),
        in_specs=[vmem_spec, vmem_spec, vmem_spec],
        out_specs=vmem_spec,
        cost_estimate=cost,
    )(q, k, v)


def sdpa_ref(q, k, v, mask):
    # Full reference, *including* the mask add, to verify the shift-invariance.
    d = q.shape[-1]
    qk = jnp.einsum("bqd,bkd->bqk", q, k) / math.sqrt(d) + mask
    attn = jax.nn.softmax(qk, axis=-1)
    return jnp.einsum("bqk,bkd->bqd", attn, v)


if __name__ == "__main__":
    B, S, D = 2, 56, 32   # mask in the PyTorch module is (1, 56, 56)

    key = jax.random.PRNGKey(0)
    kq, kk, kv = jax.random.split(key, 3)
    q = jax.random.normal(kq, (B, S, D), dtype=jnp.float32)
    k = jax.random.normal(kk, (B, S, D), dtype=jnp.float32)
    v = jax.random.normal(kv, (B, S, D), dtype=jnp.float32)

    # (torch.rand(1,56,56) > 0.7).fill_(-1e9) -> all-True bool -> adds +1.0
    mask = jnp.ones((1, S, S), dtype=jnp.float32)

    ref = sdpa_ref(q, k, v, mask)

    # Exact-reciprocal path: tight tolerance.
    out_exact = jax.block_until_ready(
        sdpa_pallas(q, k, v, mask, approx_recip=False))
    assert out_exact.shape == (B, S, D)
    assert jnp.allclose(out_exact, ref, atol=1e-5, rtol=1e-5)

    # Default (approx reciprocal) path: relaxed tolerance for EUP vrcp.
    out = jax.block_until_ready(sdpa_pallas(q, k, v, mask))
    assert out.shape == (B, S, D)
    assert jnp.allclose(out, ref, atol=5e-3, rtol=5e-3)

    print("KERNEL_OK")
</pallas_src>

<mosaic_0001>
module attributes {stable_mosaic.version = 11 : i64} {
  func.func @_attn_kernel(%arg0: memref<2x56x32xf32, #tpu.memory_space<vmem>>, %arg1: memref<2x56x32xf32, #tpu.memory_space<vmem>>, %arg2: memref<2x56x32xf32, #tpu.memory_space<vmem>>, %arg3: memref<2x56x32xf32, #tpu.memory_space<vmem>>) attributes {dimension_semantics = [], scalar_prefetch = 0 : i64, scratch_operands = 0 : i64, tpu.core_type = #tpu.core_type<tc>} {
    %c0 = arith.constant 0 : index
    %c0_0 = arith.constant 0 : index
    %c0_1 = arith.constant 0 : index
    %0 = vector.load %arg0[%c0, %c0_0, %c0_1] : memref<2x56x32xf32, #tpu.memory_space<vmem>>, vector<1x56x32xf32>
    %1 = vector.shape_cast %0 : vector<1x56x32xf32> to vector<56x32xf32>
    %cst = arith.constant 0.176776692 : f32
    %2 = vector.broadcast %cst : f32 to vector<56x32xf32>
    %3 = arith.mulf %1, %2 : vector<56x32xf32>
    %c0_2 = arith.constant 0 : index
    %c0_3 = arith.constant 0 : index
    %c0_4 = arith.constant 0 : index
    %4 = vector.load %arg1[%c0_2, %c0_3, %c0_4] : memref<2x56x32xf32, #tpu.memory_space<vmem>>, vector<1x56x32xf32>
    %5 = vector.shape_cast %4 : vector<1x56x32xf32> to vector<56x32xf32>
    %c0_5 = arith.constant 0 : index
    %c0_6 = arith.constant 0 : index
    %c0_7 = arith.constant 0 : index
    %6 = vector.load %arg2[%c0_5, %c0_6, %c0_7] : memref<2x56x32xf32, #tpu.memory_space<vmem>>, vector<1x56x32xf32>
    %7 = vector.shape_cast %6 : vector<1x56x32xf32> to vector<56x32xf32>
    %cst_8 = arith.constant dense<0.000000e+00> : vector<56x56xf32>
    %8 = tpu.matmul %3, %5, %cst_8 {dimension_numbers = #tpu.dot_dimension_numbers<[1], [1], [0], [0], [0, 0, 1, 0], [], []>} : vector<56x32xf32>, vector<56x32xf32>, vector<56x56xf32> -> vector<56x56xf32>
    %cst_9 = arith.constant dense<0xFF800000> : vector<56xf32>
    %9 = vector.multi_reduction <maximumf>, %8, %cst_9 [1] : vector<56x56xf32> to vector<56xf32>
    %10 = vector.shape_cast %9 : vector<56xf32> to vector<56x1xf32>
    %11 = vector.broadcast %10 : vector<56x1xf32> to vector<56x56xf32>
    %12 = arith.subf %8, %11 : vector<56x56xf32>
    %13 = math.exp %12 : vector<56x56xf32>
    %cst_10 = arith.constant dense<0.000000e+00> : vector<56xf32>
    %14 = vector.multi_reduction <add>, %13, %cst_10 [1] : vector<56x56xf32> to vector<56xf32>
    %15 = vector.shape_cast %14 : vector<56xf32> to vector<56x1xf32>
    %cst_11 = arith.constant dense<0.000000e+00> : vector<56x32xf32>
    %16 = tpu.matmul %13, %7, %cst_11 {dimension_numbers = #tpu.dot_dimension_numbers<[1], [0], [0], [1], [0, 0, 1, 1], [], []>} : vector<56x56xf32>, vector<56x32xf32>, vector<56x32xf32> -> vector<56x32xf32>
    %17 = tpu.reciprocal %15 : vector<56x1xf32> -> vector<56x1xf32>
    %18 = vector.broadcast %17 : vector<56x1xf32> to vector<56x32xf32>
    %19 = arith.mulf %16, %18 : vector<56x32xf32>
    %c0_12 = arith.constant 0 : index
    %c0_13 = arith.constant 0 : index
    %c0_14 = arith.constant 0 : index
    %20 = vector.load %arg3[%c0_12, %c0_13, %c0_14] : memref<2x56x32xf32, #tpu.memory_space<vmem>>, vector<1x56x32xf32>
    %21 = vector.shape_cast %20 : vector<1x56x32xf32> to vector<56x32xf32>
    %22 = vector.shape_cast %19 : vector<56x32xf32> to vector<1x56x32xf32>
    tpu.vector_store %arg3[%c0_12, %c0_13, %c0_14], %22 {strides = array<i32>} : memref<2x56x32xf32, #tpu.memory_space<vmem>>, vector<1x56x32xf32>,
    %c1 = arith.constant 1 : index
    %c0_15 = arith.constant 0 : index
    %c0_16 = arith.constant 0 : index
    %23 = vector.load %arg0[%c1, %c0_15, %c0_16] : memref<2x56x32xf32, #tpu.memory_space<vmem>>, vector<1x56x32xf32>
    %24 = vector.shape_cast %23 : vector<1x56x32xf32> to vector<56x32xf32>
    %cst_17 = arith.constant 0.176776692 : f32
    %25 = vector.broadcast %cst_17 : f32 to vector<56x32xf32>
    %26 = arith.mulf %24, %25 : vector<56x32xf32>
    %c1_18 = arith.constant 1 : index
    %c0_19 = arith.constant 0 : index
    %c0_20 = arith.constant 0 : index
    %27 = vector.load %arg1[%c1_18, %c0_19, %c0_20] : memref<2x56x32xf32, #tpu.memory_space<vmem>>, vector<1x56x32xf32>
    %28 = vector.shape_cast %27 : vector<1x56x32xf32> to vector<56x32xf32>
    %c1_21 = arith.constant 1 : index
    %c0_22 = arith.constant 0 : index
    %c0_23 = arith.constant 0 : index
    %29 = vector.load %arg2[%c1_21, %c0_22, %c0_23] : memref<2x56x32xf32, #tpu.memory_space<vmem>>, vector<1x56x32xf32>
    %30 = vector.shape_cast %29 : vector<1x56x32xf32> to vector<56x32xf32>
    %cst_24 = arith.constant dense<0.000000e+00> : vector<56x56xf32>
    %31 = tpu.matmul %26, %28, %cst_24 {dimension_numbers = #tpu.dot_dimension_numbers<[1], [1], [0], [0], [0, 0, 1, 0], [], []>} : vector<56x32xf32>, vector<56x32xf32>, vector<56x56xf32> -> vector<56x56xf32>
    %cst_25 = arith.constant dense<0xFF800000> : vector<56xf32>
    %32 = vector.multi_reduction <maximumf>, %31, %cst_25 [1] : vector<56x56xf32> to vector<56xf32>
    %33 = vector.shape_cast %32 : vector<56xf32> to vector<56x1xf32>
    %34 = vector.broadcast %33 : vector<56x1xf32> to vector<56x56xf32>
    %35 = arith.subf %31, %34 : vector<56x56xf32>
    %36 = math.exp %35 : vector<56x56xf32>
    %cst_26 = arith.constant dense<0.000000e+00> : vector<56xf32>
    %37 = vector.multi_reduction <add>, %36, %cst_26 [1] : vector<56x56xf32> to vector<56xf32>
    %38 = vector.shape_cast %37 : vector<56xf32> to vector<56x1xf32>
    %cst_27 = arith.constant dense<0.000000e+00> : vector<56x32xf32>
    %39 = tpu.matmul %36, %30, %cst_27 {dimension_numbers = #tpu.dot_dimension_numbers<[1], [0], [0], [1], [0, 0, 1, 1], [], []>} : vector<56x56xf32>, vector<56x32xf32>, vector<56x32xf32> -> vector<56x32xf32>
    %40 = tpu.reciprocal %38 : vector<56x1xf32> -> vector<56x1xf32>
    %41 = vector.broadcast %40 : vector<56x1xf32> to vector<56x32xf32>
    %42 = arith.mulf %39, %41 : vector<56x32xf32>
    %c1_28 = arith.constant 1 : index
    %c0_29 = arith.constant 0 : index
    %c0_30 = arith.constant 0 : index
    %43 = vector.load %arg3[%c1_28, %c0_29, %c0_30] : memref<2x56x32xf32, #tpu.memory_space<vmem>>, vector<1x56x32xf32>
    %44 = vector.shape_cast %43 : vector<1x56x32xf32> to vector<56x32xf32>
    %45 = vector.shape_cast %42 : vector<56x32xf32> to vector<1x56x32xf32>
    tpu.vector_store %arg3[%c1_28, %c0_29, %c0_30], %45 {strides = array<i32>} : memref<2x56x32xf32, #tpu.memory_space<vmem>>, vector<1x56x32xf32>,
    return
  }
}

</mosaic_0001>

<bundles_post_ra>
// kernel: tpu_custom_call.1
= control target key start
LH: loop header
LB: loop body
LE: loop exit
PB: predicated region body
PF: predicated region fallthrough
CT: control target
= control target key end

     0   :  { %vm42_vm0 = vcmask 261120   ;;  %v1149_v0 = vmov 0.0|0.0   ;;  %vm1150_vm2 = vmmov 0   ;;  %v1151_v4 = vmov 0.0   ;;  %s1567_s1 = inlined_call_operand.vmem [shape: f32[2,56,32], index: 1, kind: input, shape index: {}]   ;;  %s1568_s0 = inlined_call_operand.vmem [shape: f32[2,56,32], index: 0, kind: input, shape index: {}]   ;;  %s1569_s2 = inlined_call_operand.vmem [shape: f32[2,56,32], index: 2, kind: input, shape index: {}]   ;;  %s1570_s3 = inlined_call_operand.vmem [shape: f32[2,56,32], index: 3, kind: output, shape index: {}]  }
   0x1   :  { %1040 = vmatprep.subr.bf16.mxu0 %v1149_v0  ;;  %v28_v1 = vld [vmem:[%s1567_s1] sm:$0xff]  ;;  %v29_v2 = vld [vmem:[%s1567_s1 + $0x8] sm:$0xff]  ;;  %vm1181_vm1 = vmpackc.low %vm42_vm0, %vm42_vm0  ;;  %914 = vmatprep.mubr.msk.f32.mxu0 %vm1150_vm2, %v1151_v4  ;;  %vm185_vm3 = vcmask 457728  }
   0x2   :  { %v1041_v5 = vpack.c.bf16 %v29_v2, %v28_v1  ;;  %1052 = vmatprep.subr.bf16.mxu1 %v1149_v0  ;;  %949 = vmatprep.mubr.msk.f32.mxu1 %vm1150_vm2, %v1151_v4  ;;  %v30_v6 = vld [vmem:[%s1567_s1 + $0x10] sm:$0xff]  ;;  %v31_v7 = vld [vmem:[%s1567_s1 + $0x18] sm:$0xff]  ;;  %v32_v9 = vld [vmem:[%s1567_s1 + $0x20] sm:$0xff] }
   0x3   :  { %v1045_v8 = vpack.c.bf16 %v31_v7, %v30_v6  ;;  %v33_v10 = vld [vmem:[%s1567_s1 + $0x28] sm:$0xff]  ;;  %v14_v12 = vld [vmem:[%s1568_s0] sm:$0xff]  ;;  %v34_v13 = vld [vmem:[%s1567_s1 + $0x30] sm:$0xff] }
   0x4   :  { %1043 = vmatpush3.bf16.xpose.msk.msra.mxu0 %vm1181_vm1, %v1041_v5  ;;  %v1049_v11 = vpack.c.bf16 %v33_v10, %v32_v9  ;;  %v21_v14 = vmul.f32 0.17677669, %v14_v12  ;;  %v15_v15 = vld [vmem:[%s1568_s0 + $0x8] sm:$0xff]  ;;  %v16_v17 = vld [vmem:[%s1568_s0 + $0x10] sm:$0xff]  ;;  %v17_v19 = vld [vmem:[%s1568_s0 + $0x18] sm:$0xff] }
   0x5   :  { %1044 = vmatprep.subr.bf16.mxu0 %v1149_v0  ;;  %v22_v16 = vmul.f32 0.17677669, %v15_v15  ;;  %v23_v18 = vmul.f32 0.17677669, %v16_v17  ;;  %v24_v20 = vmul.f32 0.17677669, %v17_v19 }
   0x6   :  { %v18_v21 = vld [vmem:[%s1568_s0 + $0x20] sm:$0xff]  ;;  %v19_v23 = vld [vmem:[%s1568_s0 + $0x28] sm:$0xff]  ;;  %v20_v25 = vld [vmem:[%s1568_s0 + $0x30] sm:$0xff] }
   0x7   :  { %v25_v22 = vmul.f32 0.17677669, %v18_v21  ;;  %v26_v24 = vmul.f32 0.17677669, %v19_v23  ;;  %v27_v26 = vmul.f32 0.17677669, %v20_v25 }
   0x8   :  { %v35_v27 = vld [vmem:[%s1569_s2] sm:$0xff]  ;;  %v36_v28 = vld [vmem:[%s1569_s2 + $0x8] sm:$0xff]  ;;  %v37_v42 = vld [vmem:[%s1569_s2 + $0x10] sm:$0xff] }
   0x9   :  { %v1053_v29 = vpack.c.bf16 %v36_v28, %v35_v27  ;;  %v38_v43 = vld [vmem:[%s1569_s2 + $0x18] sm:$0xff]  ;;  %v39_v48 = vld [vmem:[%s1569_s2 + $0x20] sm:$0xff]  ;;  %v40_v49 = vld [vmem:[%s1569_s2 + $0x28] sm:$0xff] }
   0xa   :  { %v1056_v44 = vpack.c.bf16 %v38_v43, %v37_v42  ;;  %v1059_v50 = vpack.c.bf16 %v40_v49, %v39_v48  ;;  %v41_v55 = vld [vmem:[%s1569_s2 + $0x30] sm:$0xff]  ;;  %v802_v5 = vld [vmem:[%s1567_s1 + $0x38] sm:$0xff]  ;;  %v803_v6 = vld [vmem:[%s1567_s1 + $0x40] sm:$0xff] }
   0xb   :  { %1054 = vmatpush3.bf16.msra.mxu1 %v1053_v29  ;;  %v1062_v10 = vpack.c.bf16 %v803_v6, %v802_v5  ;;  %v804_v15 = vld [vmem:[%s1567_s1 + $0x48] sm:$0xff]  ;;  %v807_v27 = vld [vmem:[%s1567_s1 + $0x60] sm:$0xff]  ;;  %v799_v42 = vld [vmem:[%s1568_s0 + $0x58] sm:$0xff] }
   0xc   :  { %1047 = vmatpush3.bf16.xpose.msk.msra.mxu0 %vm1181_vm1, %v1045_v8  ;;  %1055 = vmatprep.subr.bf16.mxu1 %v1149_v0  ;;  %v808_v3 = vld [vmem:[%s1567_s1 + $0x68] sm:$0xff]  ;;  %v403_v43 = vmul.f32 0.17677669, %v799_v42  ;;  %v809_v48 = vld [vmem:[%s1569_s2 + $0x38] sm:$0xff]  ;;  %v810_v49 = vld [vmem:[%s1569_s2 + $0x40] sm:$0xff] }
   0xd   :  { %1048 = vmatprep.subr.bf16.mxu0 %v1149_v0 }
   0xf   :  { %1057 = vmatpush3.bf16.msra.mxu1 %v1056_v44  ;;  %v800_v44 = vld [vmem:[%s1568_s0 + $0x60] sm:$0xff] }
  0x10   :  { %1058 = vmatprep.subr.bf16.mxu1 %v1149_v0 }
  0x13   :  { %1060 = vmatpush3.bf16.msra.mxu1 %v1059_v50  ;;  %v1074_v50 = vpack.c.bf16 %v810_v49, %v809_v48 }
  0x14   :  { %1051 = vmatpush3.bf16.xpose.msk.msra.mxu0 %vm1181_vm1, %v1049_v11  ;;  %947 = vmatprep.subr.mxu1 %v1151_v4 }
  0x15   :  { %912 = vmatprep.subr.mxu0 %v1151_v4 }
  0x17   :  { %948 = vmatpush3.msra.mxu1 %v41_v55 }
  0x18   :  { %1061 = vmatprep.subr.bf16.mxu1 %v1149_v0 }
  0x1c   :  { %913 = vmatpush3.xpose.msk.msra.mxu0 %vm42_vm0, %v34_v13 }
  0x1d   :  { %1073 = vmatprep.subr.bf16.mxu0 %v1149_v0 }
  0x1f   :  { %915 = vmatmul.mubr.msk.f32.vlgmr.msra.gmra.mrb[0].mxu0 %vm42_vm0, %v21_v14 }
  0x20   :  { %917 = vmatprep.mubr.msk.f32.mxu0 %vm1150_vm2, %v1151_v4  ;;  %1075 = vmatpush3.bf16.msra.mxu0 %v1074_v50 }
  0x21   :  { %1076 = vmatprep.subr.bf16.mxu0 %v1149_v0 }
  0x23   :  { %918 = vmatmul.mubr.msk.f32.gmra.mrb[2].mxu0 %vm42_vm0, %v22_v16  ;;  %v805_v16 = vld [vmem:[%s1567_s1 + $0x50] sm:$0xff] }
  0x24   :  { %920 = vmatprep.mubr.msk.f32.mxu0 %vm1150_vm2, %v1151_v4  ;;  %v1066_v21 = vpack.c.bf16 %v805_v16, %v804_v15 }
  0x27   :  { %921 = vmatmul.mubr.msk.f32.gmra.mrb[4].mxu0 %vm42_vm0, %v23_v18 }
  0x28   :  { %923 = vmatprep.mubr.msk.f32.mxu0 %vm1150_vm2, %v1151_v4 }
  0x2b   :  { %924 = vmatmul.mubr.msk.f32.gmra.mrb[6].mxu0 %vm42_vm0, %v24_v20 }
  0x2c   :  { %926 = vmatprep.mubr.msk.f32.mxu0 %vm1150_vm2, %v1151_v4 }
  0x2f   :  { %927 = vmatmul.mubr.msk.f32.gmra.mrb[8].mxu0 %vm42_vm0, %v25_v22 }
  0x30   :  { %929 = vmatprep.mubr.msk.f32.mxu0 %vm1150_vm2, %v1151_v4 }
  0x33   :  { %930 = vmatmul.mubr.msk.f32.gmra.mrb[10].mxu0 %vm42_vm0, %v26_v24 }
  0x34   :  { %932 = vmatprep.mubr.msk.f32.mxu0 %vm1150_vm2, %v1151_v4 }
  0x37   :  { %933 = vmatmul.mubr.msk.f32.gmra.mrb[12].mxu0 %vm42_vm0, %v27_v26  ;;  %v806_v26 = vld [vmem:[%s1567_s1 + $0x58] sm:$0xff] }
  0x38   :  { %1019 = vmatprep.mubr.msk.f32.mxu0 %vm1150_vm2, %v1151_v4 }
  0xf2   :  { %v151_v30 = vpop.f32.mrb[0].mxu0 }
  0xf3   :  { %v916_v31 = vpop.f32.mrb[1].mxu0  ;;  %v186_v32 = vsel %vm185_vm3, %v151_v30, -inf }
  0xf4   :  { %187 = vmax.xlane.f32.xlu0 %v186_v32 }
  0xf6   :  { %v156_v33 = vpop.f32.mrb[2].mxu0 }
  0xf7   :  { %v189_v34 = vsel %vm185_vm3, %v156_v33, -inf  ;;  %v919_v35 = vpop.f32.mrb[3].mxu0 }
  0xf8   :  { %190 = vmax.xlane.f32.xlu0 %v189_v34 }
  0xfa   :  { %v161_v36 = vpop.f32.mrb[4].mxu0 }
  0xfb   :  { %v192_v37 = vsel %vm185_vm3, %v161_v36, -inf  ;;  %v922_v38 = vpop.f32.mrb[5].mxu0 }
  0xfc   :  { %193 = vmax.xlane.f32.xlu1 %v192_v37  ;;  %v797_v38 = vld [vmem:[%s1568_s0 + $0x48] sm:$0xff] }
  0xfe   :  { %v166_v39 = vpop.f32.mrb[6].mxu0 }
  0xff   :  { %v195_v40 = vsel %vm185_vm3, %v166_v39, -inf  ;;  %v925_v41 = vpop.f32.mrb[7].mxu0 }
 0x100   :  { %196 = vmax.xlane.f32.xlu1 %v195_v40  ;;  %v798_v40 = vld [vmem:[%s1568_s0 + $0x50] sm:$0xff] }
 0x101   :  { %v402_v41 = vmul.f32 0.17677669, %v798_v40 }
 0x102   :  { %v171_v45 = vpop.f32.mrb[8].mxu0 }
 0x103   :  { %v198_v46 = vsel %vm185_vm3, %v171_v45, -inf  ;;  %v928_v47 = vpop.f32.mrb[9].mxu0 }
 0x104   :  { %199 = vmax.xlane.f32.xlu0 %v198_v46  ;;  %v801_v46 = vld [vmem:[%s1568_s0 + $0x68] sm:$0xff] }
 0x105   :  { %v405_v47 = vmul.f32 0.17677669, %v801_v46 }
 0x106   :  { %v176_v51 = vpop.f32.mrb[10].mxu0 }
 0x107   :  { %v201_v52 = vsel %vm185_vm3, %v176_v51, -inf  ;;  %v931_v53 = vpop.f32.mrb[11].mxu0 }
 0x108   :  { %202 = vmax.xlane.f32.xlu1 %v201_v52 }
 0x10a   :  { %v181_v54 = vpop.f32.mrb[12].mxu0 }
 0x10b   :  { %v204_v56 = vsel %vm185_vm3, %v181_v54, -inf  ;;  %v934_v57 = vpop.f32.mrb[13].mxu0 }
 0x10c   :  { %205 = vmax.xlane.f32.xlu0 %v204_v56 }
 0x181   :  { %v188_v58 = vpop.xlane.xlu0 %187 }
 0x182   :  { %v207_v59 = vsub.f32 %v151_v30, %v188_v58  ;;  %v1070_v30 = vpack.c.bf16 %v807_v27, %v806_v26 }
 0x184   :  { %v214_v60 = vmul.f32 1.442695, %v207_v59 }
 0x185   :  { %v191_v61 = vpop.xlane.xlu0 %190 }
 0x186   :  { %1093 = vpow2.f32 %v214_v60  ;;  %v208_v62 = vsub.f32 %v156_v33, %v191_v61  ;;  %v795_v33 = vld [vmem:[%s1568_s0 + $0x38] sm:$0xff] }
 0x187   :  { %v399_v35 = vmul.f32 0.17677669, %v795_v33 }
 0x188   :  { %v216_v63 = vmul.f32 1.442695, %v208_v62 }
 0x189   :  { %v194_v1 = vpop.xlane.xlu1 %193 }
 0x18a   :  { %1095 = vpow2.f32 %v216_v63  ;;  %v209_v2 = vsub.f32 %v161_v36, %v194_v1  ;;  %v796_v36 = vld [vmem:[%s1568_s0 + $0x40] sm:$0xff] }
 0x18b   :  { %v400_v37 = vmul.f32 0.17677669, %v796_v36 }
 0x18c   :  { %v218_v7 = vmul.f32 1.442695, %v209_v2 }
 0x18d   :  { %v197_v8 = vpop.xlane.xlu1 %196 }
 0x18e   :  { %1097 = vpow2.f32 %v218_v7  ;;  %v210_v9 = vsub.f32 %v166_v39, %v197_v8  ;;  %v401_v39 = vmul.f32 0.17677669, %v797_v38 }
 0x190   :  { %v1296_v11 = vpop.eup %1093  ;;  %v220_v12 = vmul.f32 1.442695, %v210_v9 }
 0x191   :  { %950 = vmatmul.mubr.msk.f32.vlgmr.msra.gmra.mrb[0].mxu1 %vm185_vm3, %v1296_v11  ;;  %v200_v13 = vpop.xlane.xlu0 %199 }
 0x192   :  { %1099 = vpow2.f32 %v220_v12  ;;  %1064 = vmatpush3.bf16.xpose.msk.msra.mxu1 %vm1181_vm1, %v1062_v10  ;;  %v211_v14 = vsub.f32 %v171_v45, %v200_v13  ;;  %952 = vmatprep.mubr.msk.f32.mxu1 %vm1150_vm2, %v1151_v4  ;;  %v404_v45 = vmul.f32 0.17677669, %v800_v44 }
 0x193   :  { %1065 = vmatprep.subr.bf16.mxu1 %v1149_v0 }
 0x194   :  { %v1311_v17 = vpop.eup %1095  ;;  %v222_v18 = vmul.f32 1.442695, %v211_v14 }
 0x195   :  { %953 = vmatmul.mubr.msk.f32.gmra.mrb[2].mxu1 %vm185_vm3, %v1311_v17  ;;  %v203_v19 = vpop.xlane.xlu1 %202 }
 0x196   :  { %1101 = vpow2.f32 %v222_v18  ;;  %v212_v20 = vsub.f32 %v176_v51, %v203_v19  ;;  %955 = vmatprep.mubr.msk.f32.mxu1 %vm1150_vm2, %v1151_v4 }
 0x198   :  { %v1317_v22 = vpop.eup %1097  ;;  %v224_v23 = vmul.f32 1.442695, %v212_v20 }
 0x199   :  { %956 = vmatmul.mubr.msk.f32.gmra.mrb[4].mxu1 %vm185_vm3, %v1317_v22  ;;  %v206_v24 = vpop.xlane.xlu0 %205  ;;  %v234_v38 = vsel %vm185_vm3, %v1317_v22, 0.0 }
 0x19a   :  { %1103 = vpow2.f32 %v224_v23  ;;  %1068 = vmatpush3.bf16.xpose.msk.msra.mxu1 %vm1181_vm1, %v1066_v21  ;;  %v213_v25 = vsub.f32 %v181_v54, %v206_v24  ;;  %958 = vmatprep.mubr.msk.f32.mxu1 %vm1150_vm2, %v1151_v4  ;;  %v811_v21 = vld [vmem:[%s1569_s2 + $0x48] sm:$0xff]  ;;  %v812_v23 = vld [vmem:[%s1569_s2 + $0x50] sm:$0xff] }
 0x19b   :  { %1069 = vmatprep.subr.bf16.mxu1 %v1149_v0 }
 0x19c   :  { %v1332_v28 = vpop.eup %1099  ;;  %v226_v29 = vmul.f32 1.442695, %v213_v25  ;;  %v1077_v25 = vpack.c.bf16 %v812_v23, %v811_v21 }
 0x19d   :  { %959 = vmatmul.mubr.msk.f32.gmra.mrb[6].mxu1 %vm185_vm3, %v1332_v28  ;;  %v237_v40 = vsel %vm185_vm3, %v1332_v28, 0.0 }
 0x19e   :  { %1105 = vpow2.f32 %v226_v29  ;;  %961 = vmatprep.mubr.msk.f32.mxu1 %vm1150_vm2, %v1151_v4  ;;  %1078 = vmatpush3.bf16.msra.mxu0 %v1077_v25  ;;  %v813_v29 = vld [vmem:[%s1569_s2 + $0x58] sm:$0xff] }
 0x19f   :  { %1079 = vmatprep.subr.bf16.mxu0 %v1149_v0 }
 0x1a0   :  { %v1338_v31 = vpop.eup %1101 }
 0x1a1   :  { %962 = vmatmul.mubr.msk.f32.gmra.mrb[8].mxu1 %vm185_vm3, %v1338_v31 }
 0x1a2   :  { %1072 = vmatpush3.bf16.xpose.msk.msra.mxu1 %vm1181_vm1, %v1070_v30  ;;  %964 = vmatprep.mubr.msk.f32.mxu1 %vm1150_vm2, %v1151_v4  ;;  %v814_v30 = vld [vmem:[%s1569_s2 + $0x60] sm:$0xff] }
 0x1a3   :  { %982 = vmatprep.subr.mxu1 %v1151_v4 }
 0x1a4   :  { %v1347_v32 = vpop.eup %1103 }
 0x1a5   :  { %965 = vmatmul.mubr.msk.f32.gmra.mrb[10].mxu1 %vm185_vm3, %v1347_v32  ;;  %v243_v22 = vsel %vm185_vm3, %v1347_v32, 0.0 }
 0x1a6   :  { %967 = vmatprep.mubr.msk.f32.mxu1 %vm1150_vm2, %v1151_v4 }
 0x1a8   :  { %v1359_v34 = vpop.eup %1105 }
 0x1a9   :  { %968 = vmatmul.mubr.msk.f32.gmra.mrb[12].mxu1 %vm185_vm3, %v1359_v34 }
 0x1aa   :  { %983 = vmatpush3.xpose.msk.msra.mxu1 %vm42_vm0, %v808_v3  ;;  %984 = vmatprep.mubr.msk.f32.mxu1 %vm1150_vm2, %v1151_v4  ;;  %v1080_v3 = vpack.c.bf16 %v814_v30, %v813_v29 }
 0x1ab   :  { %1082 = vmatprep.subr.bf16.mxu1 %v1149_v0 }
 0x1ac   :  { %1081 = vmatpush3.bf16.msra.mxu0 %v1080_v3 }
 0x1ad   :  { %985 = vmatmul.mubr.msk.f32.vlgmr.msra.gmra.mrb[14].mxu1 %vm42_vm0, %v399_v35  ;;  %v228_v35 = vsel %vm185_vm3, %v1296_v11, 0.0  ;;  %1017 = vmatprep.subr.mxu0 %v1151_v4  ;;  %v815_v11 = vld [vmem:[%s1569_s2 + $0x68] sm:$0xff] }
 0x1ae   :  { %987 = vmatprep.mubr.msk.f32.mxu1 %vm1150_vm2, %v1151_v4  ;;  %1086 = vmatpush3.bf16.msra.mxu1 %v1074_v50 }
 0x1af   :  { %1083 = vmatprep.subr.bf16.mxu1 %v1149_v0 }
 0x1b0   :  { %1018 = vmatpush3.msra.mxu0 %v815_v11 }
 0x1b1   :  { %988 = vmatmul.mubr.msk.f32.gmra.mrb[16].mxu1 %vm42_vm0, %v400_v37 }
 0x1b2   :  { %990 = vmatprep.mubr.msk.f32.mxu1 %vm1150_vm2, %v1151_v4  ;;  %1087 = vmatpush3.bf16.msra.mxu1 %v1077_v25 }
 0x1b3   :  { %1084 = vmatprep.subr.bf16.mxu1 %v1149_v0  ;;  %v231_v0 = vsel %vm185_vm3, %v1311_v17, 0.0  ;;  %v246_v17 = vsel %vm185_vm3, %v1359_v34, 0.0 }
 0x1b5   :  { %991 = vmatmul.mubr.msk.f32.gmra.mrb[18].mxu1 %vm42_vm0, %v401_v39  ;;  %v240_v39 = vsel %vm185_vm3, %v1338_v31, 0.0 }
 0x1b6   :  { %993 = vmatprep.mubr.msk.f32.mxu1 %vm1150_vm2, %v1151_v4  ;;  %1088 = vmatpush3.bf16.msra.mxu1 %v1080_v3 }
 0x1b7   :  { %1085 = vmatprep.subr.mxu1 %v1151_v4 }
 0x1b9   :  { %994 = vmatmul.mubr.msk.f32.gmra.mrb[20].mxu1 %vm42_vm0, %v402_v41 }
 0x1ba   :  { %996 = vmatprep.mubr.msk.f32.mxu1 %vm1150_vm2, %v1151_v4  ;;  %1089 = vmatpush3.msra.mxu1 %v815_v11 }
 0x1bd   :  { %997 = vmatmul.mubr.msk.f32.gmra.mrb[22].mxu1 %vm42_vm0, %v403_v43 }
 0x1be   :  { %999 = vmatprep.mubr.msk.f32.mxu1 %vm1150_vm2, %v1151_v4 }
 0x1c1   :  { %1000 = vmatmul.mubr.msk.f32.gmra.mrb[24].mxu1 %vm42_vm0, %v404_v45 }
 0x1c2   :  { %1002 = vmatprep.mubr.msk.f32.mxu1 %vm1150_vm2, %v1151_v4 }
 0x1c5   :  { %1003 = vmatmul.mubr.msk.f32.gmra.mrb[26].mxu1 %vm42_vm0, %v405_v47 }
 0x1c6   :  { %1037 = vmatprep.mubr.msk.f32.mxu1 %vm1150_vm2, %v1151_v4 }
 0x264   :  { %v1414_v51 = vpop.f32.mrb[0].mxu1 }
 0x265   :  { %v951_v52 = vpop.f32.mrb[1].mxu1 }
 0x268   :  { %v1416_v53 = vpop.f32.mrb[2].mxu1 }
 0x269   :  { %v954_v54 = vpop.f32.mrb[3].mxu1 }
 0x26c   :  { %v1418_v55 = vpop.f32.mrb[4].mxu1 }
 0x26d   :  { %v957_v56 = vpop.f32.mrb[5].mxu1 }
 0x270   :  { %v1420_v57 = vpop.f32.mrb[6].mxu1 }
 0x271   :  { %v960_v58 = vpop.f32.mrb[7].mxu1 }
 0x274   :  { %v1422_v59 = vpop.f32.mrb[8].mxu1 }
 0x275   :  { %v963_v60 = vpop.f32.mrb[9].mxu1 }
 0x278   :  { %v1424_v61 = vpop.f32.mrb[10].mxu1 }
 0x279   :  { %v966_v62 = vpop.f32.mrb[11].mxu1 }
 0x27c   :  { %v1426_v63 = vpop.f32.mrb[12].mxu1 }
 0x27d   :  { %v969_v1 = vpop.f32.mrb[13].mxu1 }
 0x280   :  { %v530_v2 = vpop.f32.mrb[14].mxu1 }
 0x281   :  { %v564_v5 = vsel %vm185_vm3, %v530_v2, -inf  ;;  %v986_v6 = vpop.f32.mrb[15].mxu1 }
 0x282   :  { %565 = vmax.xlane.f32.xlu1 %v564_v5 }
 0x284   :  { %v535_v7 = vpop.f32.mrb[16].mxu1 }
 0x285   :  { %v567_v8 = vsel %vm185_vm3, %v535_v7, -inf  ;;  %v989_v9 = vpop.f32.mrb[17].mxu1 }
 0x286   :  { %568 = vmax.xlane.f32.xlu0 %v567_v8 }
 0x288   :  { %v540_v10 = vpop.f32.mrb[18].mxu1 }
 0x289   :  { %v570_v12 = vsel %vm185_vm3, %v540_v10, -inf  ;;  %v992_v13 = vpop.f32.mrb[19].mxu1 }
 0x28a   :  { %571 = vmax.xlane.f32.xlu1 %v570_v12 }
 0x28c   :  { %v545_v14 = vpop.f32.mrb[20].mxu1 }
 0x28d   :  { %v573_v15 = vsel %vm185_vm3, %v545_v14, -inf  ;;  %v995_v16 = vpop.f32.mrb[21].mxu1 }
 0x28e   :  { %574 = vmax.xlane.f32.xlu0 %v573_v15 }
 0x290   :  { %v1432_v18 = vpop.f32.mrb[22].mxu1 }
 0x291   :  { %v576_v19 = vsel %vm185_vm3, %v1432_v18, -inf  ;;  %v998_v20 = vpop.f32.mrb[23].mxu1 }
 0x292   :  { %577 = vmax.xlane.f32.xlu1 %v576_v19 }
 0x294   :  { %v1442_v24 = vpop.f32.mrb[24].mxu1 }
 0x295   :  { %v579_v26 = vsel %vm185_vm3, %v1442_v24, -inf  ;;  %v1001_v27 = vpop.f32.mrb[25].mxu1 }
 0x296   :  { %580 = vmax.xlane.f32.xlu0 %v579_v26 }
 0x298   :  { %v1453_v33 = vpop.f32.mrb[26].mxu1 }
 0x299   :  { %v582_v36 = vsel %vm185_vm3, %v1453_v33, -inf  ;;  %v1004_v37 = vpop.f32.mrb[27].mxu1 }
 0x29a   :  { %229 = vadd.xlane.f32.xlu0 %v228_v35  ;;  %583 = vmax.xlane.f32.xlu1 %v582_v36 }
 0x29e   :  { %235 = vadd.xlane.f32.xlu0 %v234_v38  ;;  %232 = vadd.xlane.f32.xlu1 %v231_v0 }
 0x2a2   :  { %241 = vadd.xlane.f32.xlu0 %v240_v39  ;;  %238 = vadd.xlane.f32.xlu1 %v237_v40 }
 0x2a6   :  { %244 = vadd.xlane.f32.xlu1 %v243_v22  ;;  %247 = vadd.xlane.f32.xlu0 %v246_v17 }
 0x30f   :  { %v566_v41 = vpop.xlane.xlu1 %565 }
 0x310   :  { %v585_v42 = vsub.f32 %v530_v2, %v566_v41 }
 0x312   :  { %v592_v43 = vmul.f32 1.442695, %v585_v42 }
 0x313   :  { %v569_v44 = vpop.xlane.xlu0 %568 }
 0x314   :  { %1107 = vpow2.f32 %v592_v43  ;;  %v586_v45 = vsub.f32 %v535_v7, %v569_v44 }
 0x316   :  { %v594_v31 = vmul.f32 1.442695, %v586_v45 }
 0x317   :  { %v572_v46 = vpop.xlane.xlu1 %571 }
 0x318   :  { %1109 = vpow2.f32 %v594_v31  ;;  %v587_v28 = vsub.f32 %v540_v10, %v572_v46 }
 0x31a   :  { %v596_v47 = vmul.f32 1.442695, %v587_v28 }
 0x31b   :  { %v575_v48 = vpop.xlane.xlu0 %574 }
 0x31c   :  { %1111 = vpow2.f32 %v596_v47  ;;  %v588_v49 = vsub.f32 %v545_v14, %v575_v48 }
 0x31e   :  { %v1108_v32 = vpop.eup %1107  ;;  %v598_v50 = vmul.f32 1.442695, %v588_v49 }
 0x31f   :  { %1020 = vmatmul.mubr.msk.f32.vlgmr.msra.gmra.mrb[14].mxu0 %vm185_vm3, %v1108_v32  ;;  %v578_v34 = vpop.xlane.xlu1 %577  ;;  %v606_v52 = vsel %vm185_vm3, %v1108_v32, 0.0 }
 0x320   :  { %1113 = vpow2.f32 %v598_v50  ;;  %v589_v54 = vsub.f32 %v1432_v18, %v578_v34  ;;  %607 = vadd.xlane.f32.xlu1 %v606_v52  ;;  %1022 = vmatprep.mubr.msk.f32.mxu0 %vm1150_vm2, %v1151_v4 }
 0x322   :  { %v1110_v56 = vpop.eup %1109  ;;  %v600_v58 = vmul.f32 1.442695, %v589_v54 }
 0x323   :  { %1023 = vmatmul.mubr.msk.f32.gmra.mrb[16].mxu0 %vm185_vm3, %v1110_v56  ;;  %v581_v60 = vpop.xlane.xlu0 %580  ;;  %v609_v62 = vsel %vm185_vm3, %v1110_v56, 0.0 }
 0x324   :  { %1115 = vpow2.f32 %v600_v58  ;;  %v590_v1 = vsub.f32 %v1442_v24, %v581_v60  ;;  %610 = vadd.xlane.f32.xlu0 %v609_v62  ;;  %1025 = vmatprep.mubr.msk.f32.mxu0 %vm1150_vm2, %v1151_v4 }
 0x326   :  { %v1112_v2 = vpop.eup %1111  ;;  %v602_v5 = vmul.f32 1.442695, %v590_v1 }
 0x327   :  { %1026 = vmatmul.mubr.msk.f32.gmra.mrb[18].mxu0 %vm185_vm3, %v1112_v2  ;;  %v230_v6 = vpop.xlane.xlu0 %229  ;;  %v584_v7 = vpop.xlane.xlu1 %583  ;;  %v612_v8 = vsel %vm185_vm3, %v1112_v2, 0.0 }
 0x328   :  { %1117 = vpow2.f32 %v602_v5  ;;  %v591_v9 = vsub.f32 %v1453_v33, %v584_v7  ;;  %613 = vadd.xlane.f32.xlu1 %v612_v8  ;;  %1028 = vmatprep.mubr.msk.f32.mxu0 %vm1150_vm2, %v1151_v4 }
 0x329   :  { %1119 = vrcp.f32 %v230_v6 }
 0x32a   :  { %v1114_v10 = vpop.eup %1113  ;;  %v604_v12 = vmul.f32 1.442695, %v591_v9 }
 0x32b   :  { %1029 = vmatmul.mubr.msk.f32.gmra.mrb[20].mxu0 %vm185_vm3, %v1114_v10  ;;  %v236_v13 = vpop.xlane.xlu0 %235  ;;  %v233_v14 = vpop.xlane.xlu1 %232  ;;  %v615_v15 = vsel %vm185_vm3, %v1114_v10, 0.0 }
 0x32c   :  { %1121 = vpow2.f32 %v604_v12  ;;  %616 = vadd.xlane.f32.xlu0 %v615_v15  ;;  %1031 = vmatprep.mubr.msk.f32.mxu0 %vm1150_vm2, %v1151_v4 }
 0x32d   :  { %1123 = vrcp.f32 %v236_v13 }
 0x32e   :  { %v1116_v16 = vpop.eup %1115  ;;  %1125 = vrcp.f32 %v233_v14 }
 0x32f   :  { %1032 = vmatmul.mubr.msk.f32.gmra.mrb[22].mxu0 %vm185_vm3, %v1116_v16  ;;  %v242_v18 = vpop.xlane.xlu0 %241  ;;  %v239_v19 = vpop.xlane.xlu1 %238  ;;  %v618_v20 = vsel %vm185_vm3, %v1116_v16, 0.0 }
 0x330   :  { %1127 = vrcp.f32 %v242_v18  ;;  %619 = vadd.xlane.f32.xlu1 %v618_v20  ;;  %1034 = vmatprep.mubr.msk.f32.mxu0 %vm1150_vm2, %v1151_v4 }
 0x331   :  { %1129 = vrcp.f32 %v239_v19 }
 0x332   :  { %v1118_v21 = vpop.eup %1117 }
 0x333   :  { %v1120_v23 = vpop.eup %1119  ;;  %1035 = vmatmul.mubr.msk.f32.gmra.mrb[24].mxu0 %vm185_vm3, %v1118_v21  ;;  %v245_v24 = vpop.xlane.xlu1 %244  ;;  %v621_v26 = vsel %vm185_vm3, %v1118_v21, 0.0 }
 0x334   :  { %v248_v25 = vpop.xlane.xlu0 %247  ;;  %v377_v27 = vmul.f32 %v1120_v23, %v1414_v51  ;;  %1131 = vrcp.f32 %v245_v24  ;;  %622 = vadd.xlane.f32.xlu0 %v621_v26 }
 0x335   :  { %1133 = vrcp.f32 %v248_v25 }
 0x336   :  { %v1122_v29 = vpop.eup %1121  ;;  %384 = vst.msk [vmem:[%s1570_s3] sm:$0xff] %vm42_vm0, %v377_v27 }
 0x337   :  { %v1124_v4 = vpop.eup %1123  ;;  %1038 = vmatmul.mubr.msk.f32.vlgmr.msra.gmra.mrb[28].mxu1 %vm185_vm3, %v1122_v29  ;;  %v624_v30 = vsel %vm185_vm3, %v1122_v29, 0.0 }
 0x338   :  { %v1126_v33 = vpop.eup %1125  ;;  %v379_v3 = vmul.f32 %v1124_v4, %v1418_v55  ;;  %625 = vadd.xlane.f32.xlu1 %v624_v30 }
 0x339   :  { %v378_v51 = vmul.f32 %v1126_v33, %v1416_v53 }
 0x33a   :  { %v1128_v35 = vpop.eup %1127  ;;  %386 = vst.msk [vmem:[%s1570_s3 + $0x10] sm:$0xff] %vm42_vm0, %v379_v3 }
 0x33b   :  { %v1130_v36 = vpop.eup %1129  ;;  %385 = vst.msk [vmem:[%s1570_s3 + $0x8] sm:$0xff] %vm42_vm0, %v378_v51  ;;  %v381_v37 = vmul.f32 %v1128_v35, %v1422_v59 }
 0x33c   :  { %v380_v38 = vmul.f32 %v1130_v36, %v1420_v57 }
 0x33d   :  { %388 = vst.msk [vmem:[%s1570_s3 + $0x20] sm:$0xff] %vm42_vm0, %v381_v37 }
 0x33e   :  { %v1132_v53 = vpop.eup %1131  ;;  %387 = vst.msk [vmem:[%s1570_s3 + $0x18] sm:$0xff] %vm42_vm0, %v380_v38 }
 0x33f   :  { %v1134_v55 = vpop.eup %1133  ;;  %v382_v0 = vmul.f32 %v1132_v53, %v1424_v61 }
 0x340   :  { %v383_v11 = vmul.f32 %v1134_v55, %v1426_v63 }
 0x341   :  { %389 = vst.msk [vmem:[%s1570_s3 + $0x28] sm:$0xff] %vm42_vm0, %v382_v0 }
 0x342   :  { %390 = vst.msk [vmem:[%s1570_s3 + $0x30] sm:$0xff] %vm42_vm0, %v383_v11 }
 0x3ad   :  { %v608_v57 = vpop.xlane.xlu1 %607 }
 0x3ae   :  { %1135 = vrcp.f32 %v608_v57 }
 0x3b1   :  { %v611_v59 = vpop.xlane.xlu0 %610 }
 0x3b2   :  { %1137 = vrcp.f32 %v611_v59 }
 0x3b5   :  { %v614_v39 = vpop.xlane.xlu1 %613 }
 0x3b6   :  { %1139 = vrcp.f32 %v614_v39 }
 0x3b8   :  { %v1136_v61 = vpop.eup %1135 }
 0x3b9   :  { %v617_v40 = vpop.xlane.xlu0 %616 }
 0x3ba   :  { %1141 = vrcp.f32 %v617_v40 }
 0x3bc   :  { %v1138_v42 = vpop.eup %1137 }
 0x3bd   :  { %v620_v41 = vpop.xlane.xlu1 %619 }
 0x3be   :  { %1143 = vrcp.f32 %v620_v41 }
 0x3c0   :  { %v1140_v46 = vpop.eup %1139 }
 0x3c1   :  { %v623_v31 = vpop.xlane.xlu0 %622 }
 0x3c2   :  { %1145 = vrcp.f32 %v623_v31 }
 0x3c4   :  { %v1142_v32 = vpop.eup %1141 }
 0x3c5   :  { %v626_v49 = vpop.xlane.xlu1 %625 }
 0x3c6   :  { %1147 = vrcp.f32 %v626_v49 }
 0x3c8   :  { %v1144_v54 = vpop.eup %1143 }
 0x3cc   :  { %v1146_v62 = vpop.eup %1145 }
 0x3d0   :  { %v1148_v6 = vpop.eup %1147 }
 0x3f2   :  { %v714_v22 = vpop.f32.mrb[14].mxu0 }
 0x3f3   :  { %v755_v63 = vmul.f32 %v1136_v61, %v714_v22  ;;  %v1021_v17 = vpop.f32.mrb[15].mxu0 }
 0x3f5   :  { %837 = vst.msk [vmem:[%s1570_s3 + $0x38] sm:$0xff] %vm42_vm0, %v755_v63 }
 0x3f6   :  { %v719_v43 = vpop.f32.mrb[16].mxu0 }
 0x3f7   :  { %v756_v44 = vmul.f32 %v1138_v42, %v719_v43  ;;  %v1024_v45 = vpop.f32.mrb[17].mxu0 }
 0x3f9   :  { %838 = vst.msk [vmem:[%s1570_s3 + $0x40] sm:$0xff] %vm42_vm0, %v756_v44 }
 0x3fa   :  { %v724_v28 = vpop.f32.mrb[18].mxu0 }
 0x3fb   :  { %v757_v47 = vmul.f32 %v1140_v46, %v724_v28  ;;  %v1027_v48 = vpop.f32.mrb[19].mxu0 }
 0x3fd   :  { %839 = vst.msk [vmem:[%s1570_s3 + $0x48] sm:$0xff] %vm42_vm0, %v757_v47 }
 0x3fe   :  { %v729_v50 = vpop.f32.mrb[20].mxu0 }
 0x3ff   :  { %v758_v34 = vmul.f32 %v1142_v32, %v729_v50  ;;  %v1030_v52 = vpop.f32.mrb[21].mxu0 }
 0x401   :  { %840 = vst.msk [vmem:[%s1570_s3 + $0x50] sm:$0xff] %vm42_vm0, %v758_v34 }
 0x402   :  { %v734_v56 = vpop.f32.mrb[22].mxu0 }
 0x403   :  { %v759_v58 = vmul.f32 %v1144_v54, %v734_v56  ;;  %v1033_v60 = vpop.f32.mrb[23].mxu0 }
 0x405   :  { %841 = vst.msk [vmem:[%s1570_s3 + $0x58] sm:$0xff] %vm42_vm0, %v759_v58 }
 0x406   :  { %v739_v1 = vpop.f32.mrb[24].mxu0 }
 0x407   :  { %v760_v2 = vmul.f32 %v1146_v62, %v739_v1  ;;  %v1036_v5 = vpop.f32.mrb[25].mxu0 }
 0x409   :  { %842 = vst.msk [vmem:[%s1570_s3 + $0x60] sm:$0xff] %vm42_vm0, %v760_v2 }
 0x40a   :  { %v744_v7 = vpop.f32.mrb[28].mxu1 }
 0x40b   :  { %v761_v8 = vmul.f32 %v1148_v6, %v744_v7  ;;  %v1039_v9 = vpop.f32.mrb[29].mxu1 }
 0x40d   :  { %843 = vst.msk [vmem:[%s1570_s3 + $0x68] sm:$0xff] %vm42_vm0, %v761_v8 }

</bundles_post_ra>
